<compile_context>
chip_gen: v5e
topology: v5e:2x2
jax: 0.10.0
libtpu: 0.0.40
codegen_flags: <defaults>
</compile_context>

<pallas_src>
import functools

import jax
import jax.numpy as jnp
from jax.experimental import pallas as pl
from jax.experimental.pallas import tpu as pltpu


def _rmsnorm_kernel(x_ref, w_ref, o_ref, *, eps):
    # Reduction in float32, exactly like the PyTorch module.
    x32 = x_ref[...].astype(jnp.float32)                      # (tile, H)  VPU
    variance = jnp.mean(x32 * x32, axis=-1, keepdims=True)    # (tile, 1)  XLU
    inv = jax.lax.rsqrt(variance + eps)                       # EUP
    # Re-cast from the input ref for the scale step so the f32 copy above does
    # not need to stay live across the whole reduction (VMEM pressure).
    x_norm = (x_ref[...].astype(jnp.float32) * inv).astype(x_ref.dtype)
    # weight * hidden_states.to(input_dtype)   (PyTorch promotion semantics)
    o_ref[...] = (w_ref[...] * x_norm).astype(o_ref.dtype)


def _tpu_target_info():
    """Best-effort (vmem_limit_bytes, tensorcores_per_chip) for the local TPU."""
    kind = ""
    try:
        kind = jax.devices()[0].device_kind.lower()
    except Exception:
        pass
    is_v7 = ("v7" in kind) or ("tpu7" in kind)
    two_tc = is_v7 or ("v4" in kind) or ("v5p" in kind)
    if is_v7:
        vmem_limit = 48 * 1024 * 1024        # 64 MiB physical per TC on v7x
    elif ("v5 lite" in kind) or ("v5e" in kind) or ("v6" in kind):
        vmem_limit = 64 * 1024 * 1024        # 128 MiB physical on v5e/v6e
    else:
        vmem_limit = 48 * 1024 * 1024        # safe default for unknown chips
    return vmem_limit, (2 if two_tc else 1)


def _pick_row_tile(rows, hidden, in_dtype, out_dtype, *,
                   vmem_budget_bytes, num_cores,
                   target_block_bytes=8 * 1024 * 1024):
    """Row tile sized by bytes (not a row cap), with full VMEM accounting."""
    in_b = jnp.dtype(in_dtype).itemsize
    out_b = jnp.dtype(out_dtype).itemsize
    sub = max(8, 32 // in_b)        # sublane pack: 8 f32, 16 bf16, 32 int8/fp8

    if rows <= sub:
        return max(int(rows), 1)    # full-extent block is always legal

    # Per-row VMEM cost of one grid step:
    #   2x double-buffered input block + 2x double-buffered output block
    #   + ~2 f32 working copies of the tile inside the kernel body.
    bytes_per_row = hidden * (2 * (in_b + out_b) + 8)
    fixed_bytes = 2 * hidden * 4                    # resident weight block
    budget_tile = max((vmem_budget_bytes - fixed_bytes) // bytes_per_row, sub)

    # Size the streaming DMA by bytes: an ~8 MiB input block sits past the HBM
    # roofline knee on all generations regardless of hidden size.
    target_tile = max(target_block_bytes // (hidden * in_b), sub)

    tile = min(budget_tile, target_tile)
    tile = max((tile // sub) * sub, sub)

    if num_cores >= 2:
        # Give each TensorCore >= ~3 grid steps so prefetch / writeback overlap
        # compute, and prefer an even total step count so the cores balance.
        cap = -(-rows // (3 * num_cores))
        cap = -(-cap // sub) * sub
        tile = min(tile, max(cap, sub))
        steps = -(-rows // tile)
        if steps > 1 and steps % 2 == 1:
            even_tile = -(-rows // (steps + 1))
            even_tile = -(-even_tile // sub) * sub
            if even_tile >= sub:
                tile = min(tile, even_tile)
    # Single-TC chips (v5e/v6e): never shrink the tile just to grow the grid;
    # that only adds ~0.35 us per extra step and shortens the DMAs.

    return int(min(tile, rows))


def mamba_rms_norm(hidden_states, weight, eps=1e-6, *,
                   row_tile=None, out_dtype=None):
    """hidden_states: (..., hidden), weight: (hidden,). Matches MambaRMSNorm.forward.

    out_dtype: opt-in override (e.g. jnp.bfloat16 to keep bf16-in/bf16-out and
    save HBM traffic).  Default follows PyTorch promotion: weight * x.to(input_dtype).
    """
    orig_shape = hidden_states.shape
    hidden = orig_shape[-1]
    x2d = hidden_states.reshape(-1, hidden)
    rows = x2d.shape[0]

    if out_dtype is None:
        out_dtype = jnp.promote_types(weight.dtype, hidden_states.dtype)
    out_dtype = jnp.dtype(out_dtype)

    vmem_limit, num_cores = _tpu_target_info()
    if row_tile is None:
        row_tile = _pick_row_tile(
            rows, hidden, x2d.dtype, out_dtype,
            vmem_budget_bytes=vmem_limit - 8 * 1024 * 1024,   # compiler headroom
            num_cores=num_cores)
    row_tile = max(1, min(int(row_tile), rows))

    # Ragged tail blocks are read-padded / write-masked by Pallas.
    grid = (pl.cdiv(rows, row_tile),)

    # Real Mamba hidden sizes are multiples of 128 (lane-dense stores). Smaller
    # hidden still works (the block spans the full dim) but wastes vreg lanes.
    w2d = weight.reshape(1, hidden)

    in_b = jnp.dtype(x2d.dtype).itemsize
    out_b = out_dtype.itemsize
    cost = pl.CostEstimate(
        flops=4 * rows * hidden,
        transcendentals=rows,
        bytes_accessed=rows * hidden * (in_b + out_b)
        + hidden * jnp.dtype(weight.dtype).itemsize,
    )

    kernel = functools.partial(_rmsnorm_kernel, eps=eps)

    out2d = pl.pallas_call(
        kernel,
        out_shape=jax.ShapeDtypeStruct((rows, hidden), out_dtype),
        grid_spec=pltpu.PrefetchScalarGridSpec(
            num_scalar_prefetch=0,
            grid=grid,
            in_specs=[
                pl.BlockSpec((row_tile, hidden), lambda i: (i, 0)),
                pl.BlockSpec((1, hidden), lambda i: (0, 0)),   # resident weight
            ],
            out_specs=pl.BlockSpec((row_tile, hidden), lambda i: (i, 0)),
        ),
        compiler_params=pltpu.CompilerParams(
            dimension_semantics=("parallel",),
            vmem_limit_bytes=vmem_limit,
        ),
        cost_estimate=cost,
    )(x2d, w2d)

    return out2d.reshape(orig_shape)


def mamba_rms_norm_ref(hidden_states, weight, eps=1e-6):
    """Pure-JAX reference mirroring the PyTorch forward."""
    input_dtype = hidden_states.dtype
    x = hidden_states.astype(jnp.float32)
    variance = jnp.mean(x * x, axis=-1, keepdims=True)
    x = x * jax.lax.rsqrt(variance + eps)
    return weight * x.astype(input_dtype)


if __name__ == "__main__":
    key = jax.random.PRNGKey(0)
    k0, k1 = jax.random.split(key)

    # Case 1: f32 input, lane-dense hidden (multiple of 128), divisible rows.
    batch, seq, hidden = 2, 8, 256
    x = jax.random.normal(k0, (batch, seq, hidden), dtype=jnp.float32)
    weight = jnp.ones((hidden,), dtype=jnp.float32)   # nn.Parameter(torch.ones(H))

    out = jax.block_until_ready(mamba_rms_norm(x, weight, eps=1e-6))
    ref = mamba_rms_norm_ref(x, weight, eps=1e-6)
    assert out.shape == ref.shape and out.dtype == ref.dtype, (out.shape, out.dtype)
    assert jnp.allclose(out, ref, atol=1e-5, rtol=1e-5), "f32 mismatch vs reference"

    # Case 2: bf16 input with a ragged row count (exercises the cdiv tail block).
    xb = jax.random.normal(k1, (3, 7, hidden), dtype=jnp.bfloat16)
    outb = jax.block_until_ready(mamba_rms_norm(xb, weight, eps=1e-6))
    refb = mamba_rms_norm_ref(xb, weight, eps=1e-6)
    assert outb.shape == refb.shape and outb.dtype == refb.dtype, (outb.shape, outb.dtype)
    assert jnp.allclose(outb, refb, atol=3e-2, rtol=3e-2), "bf16 mismatch vs reference"

    # Case 3: opt-in bf16 output (bandwidth saver; relaxes PyTorch promotion).
    outc = jax.block_until_ready(
        mamba_rms_norm(xb, weight, eps=1e-6, out_dtype=jnp.bfloat16))
    refc = refb.astype(jnp.bfloat16)
    assert outc.shape == refc.shape and outc.dtype == jnp.bfloat16
    assert jnp.allclose(outc.astype(jnp.float32), refc.astype(jnp.float32),
                        atol=5e-2, rtol=5e-2), "bf16-out mismatch vs reference"

    print("KERNEL_OK")
</pallas_src>

<mosaic_0001>
module attributes {stable_mosaic.version = 11 : i64} {
  func.func @_rmsnorm_kernel(%arg0: i32, %arg1: memref<16x256xf32, #tpu.memory_space<vmem>>, %arg2: memref<1x256xf32, #tpu.memory_space<vmem>>, %arg3: memref<16x256xf32, #tpu.memory_space<vmem>>) attributes {dimension_semantics = [#tpu.dimension_semantics<parallel>], iteration_bounds = array<i64: 1>, scalar_prefetch = 0 : i64, scratch_operands = 0 : i64, tpu.core_type = #tpu.core_type<tc>, window_params = [{transform_indices = @transform_0, window_bounds = array<i64: 16, 256>}, {pipeline_mode = #tpu.pipeline_mode<synchronous>, transform_indices = @transform_1, window_bounds = array<i64: 1, 256>}, {transform_indices = @transform_2, window_bounds = array<i64: 16, 256>}]} {
    %c0 = arith.constant 0 : index
    %c0_0 = arith.constant 0 : index
    %0 = vector.load %arg1[%c0, %c0_0] : memref<16x256xf32, #tpu.memory_space<vmem>>, vector<16x256xf32>
    %1 = arith.mulf %0, %0 : vector<16x256xf32>
    %cst = arith.constant dense<0.000000e+00> : vector<16xf32>
    %2 = vector.multi_reduction <add>, %1, %cst [1] : vector<16x256xf32> to vector<16xf32>
    %3 = vector.shape_cast %2 : vector<16xf32> to vector<16x1xf32>
    %cst_1 = arith.constant 2.560000e+02 : f32
    %4 = vector.broadcast %cst_1 : f32 to vector<16x1xf32>
    %5 = arith.divf %3, %4 : vector<16x1xf32>
    %cst_2 = arith.constant 9.99999997E-7 : f32
    %6 = vector.broadcast %cst_2 : f32 to vector<16x1xf32>
    %7 = arith.addf %5, %6 : vector<16x1xf32>
    %8 = math.rsqrt %7 : vector<16x1xf32>
    %c0_3 = arith.constant 0 : index
    %c0_4 = arith.constant 0 : index
    %9 = vector.load %arg1[%c0_3, %c0_4] : memref<16x256xf32, #tpu.memory_space<vmem>>, vector<16x256xf32>
    %10 = vector.broadcast %8 : vector<16x1xf32> to vector<16x256xf32>
    %11 = arith.mulf %9, %10 : vector<16x256xf32>
    %c0_5 = arith.constant 0 : index
    %c0_6 = arith.constant 0 : index
    %12 = vector.load %arg2[%c0_5, %c0_6] : memref<1x256xf32, #tpu.memory_space<vmem>>, vector<1x256xf32>
    %13 = vector.broadcast %12 : vector<1x256xf32> to vector<16x256xf32>
    %14 = arith.mulf %13, %11 : vector<16x256xf32>
    %c0_7 = arith.constant 0 : index
    %c0_8 = arith.constant 0 : index
    %15 = vector.load %arg3[%c0_7, %c0_8] : memref<16x256xf32, #tpu.memory_space<vmem>>, vector<16x256xf32>
    tpu.vector_store %arg3[%c0_7, %c0_8], %14 {strides = array<i32>} : memref<16x256xf32, #tpu.memory_space<vmem>>, vector<16x256xf32>,
    return
  }
  func.func @transform_0(%arg0: i32) -> (i32, i32) {
    %c0_i32 = arith.constant 0 : i32
    %c0_i32_0 = arith.constant 0 : i32
    return %arg0, %c0_i32 : i32, i32
  }
  func.func @transform_1(%arg0: i32) -> (i32, i32) {
    %c0_i32 = arith.constant 0 : i32
    %c0_i32_0 = arith.constant 0 : i32
    %c0_i32_1 = arith.constant 0 : i32
    return %c0_i32, %c0_i32_0 : i32, i32
  }
  func.func @transform_2(%arg0: i32) -> (i32, i32) {
    %c0_i32 = arith.constant 0 : i32
    %c0_i32_0 = arith.constant 0 : i32
    return %arg0, %c0_i32 : i32, i32
  }
}

</mosaic_0001>

<bundles_post_ra>
// kernel: tpu_custom_call.1
= control target key start
LH: loop header
LB: loop body
LE: loop exit
PB: predicated region body
PF: predicated region fallthrough
CT: control target
= control target key end

     0   :  { %7 = vsyncpa [#allocation3], 0  ;;  %s251_s0 = inlined_call_operand.hbm [shape: f32[16,256], index: 0, kind: input, shape index: {}]   ;;  %s252_s1 = inlined_call_operand.hbm [shape: f32[1,256], index: 1, kind: input, shape index: {}]   ;;  %s253_s2 = inlined_call_operand.hbm [shape: f32[16,256], index: 2, kind: output, shape index: {}]  }
   0x1   :  { %8 = vsyncpa [#allocation6], 0 }
   0x2   :  { %9 = vsyncpa [#allocation4], 0  ;;  %s14_s11 = sshll.u32 %s251_s0, 4  ;;  %s215_s12 = smov [#allocation2]   ;;  %s15_s11 = int_to_ptr.hbm [resolvable:$true] %s14_s11 }
   0x3   :  { %s16_s13 = sshll.u32 %s215_s12, 4  ;;  %s28_s16 = sshll.u32 %s252_s1, 4  ;;  %s17_s13 = int_to_ptr.vmem [resolvable:$true] %s16_s13  ;;  %s29_s16 = int_to_ptr.hbm [resolvable:$true] %s28_s16 }
   0x4   :  { %s216_s17 = smov 256   ;;  %s217_s18 = smov 16  }
   0x5   :  { %22 = dma.hbm_to_vmem [thread:$0]  %s15_s11, 512, %s17_s13, [#allocation3], %s216_s17, %s216_s17, %s217_s18  }
   0x6   :  { %s218_s19 = smov [#allocation5]  }
   0x7   :  { %s30_s20 = sshll.u32 %s218_s19, 4  ;;  %s31_s20 = int_to_ptr.vmem [resolvable:$true] %s30_s20 }
   0x8   :  { %33 = dma.hbm_to_vmem [thread:$0]  %s29_s16, 32, %s31_s20, [#allocation6]  }
   0x9   :  { %209 = dma.done.wait [#allocation3], 512  }
   0xa   :  { %210 = vsyncadd [#allocation3], 4294966784 }
   0xb   :  { %211 = dma.done.wait [#allocation6], 32  }
   0xc   :  { %212 = vsyncadd [#allocation6], 4294967264  ;;  %v42_v0 = vld [vmem:[#allocation2] sm:$0xff]  ;;  %v43_v1 = vld [vmem:[#allocation2 + $0x8] sm:$0xff]  ;;  %v219_v10 = vmov 256.0   ;;  %s220_s0 = smov [#allocation7]  }
   0xd   :  { %v46_v2 = vmul.f32 %v42_v0, %v42_v0  ;;  %v47_v3 = vmul.f32 %v43_v1, %v43_v1  ;;  %v44_v4 = vld [vmem:[#allocation2 + $0x10] sm:$0xff]  ;;  %v45_v5 = vld [vmem:[#allocation2 + $0x18] sm:$0xff]  ;;  %131 = vrcp.f32 %v219_v10  ;;  %v91_v27 = vld [vmem:[#allocation5] sm:$0x3]  ;;  %s109_s1 = sshll.u32 %s220_s0, 4  ;;  %s111_s23 = sshll.u32 %s253_s2, 4  ;;  %s110_s1 = int_to_ptr.vmem [resolvable:$true] %s109_s1  ;;  %s112_s23 = int_to_ptr.hbm [resolvable:$true] %s111_s23 }
   0xe   :  { %v48_v7 = vmul.f32 %v44_v4, %v44_v4  ;;  %v49_v8 = vmul.f32 %v45_v5, %v45_v5  ;;  %v93_v32 = vperm.slane %v91_v27, 0  ;;  %v94_v33 = vperm.slane %v91_v27, 1 }
   0xf   :  { %v50_v6 = vadd.f32 %v47_v3, %v46_v2 }
  0x10   :  { %v53_v9 = vadd.f32 %v49_v8, %v48_v7 }
  0x11   :  { %51 = vadd.xlane.f32.xlu0 %v50_v6 }
  0x13   :  { %v132_v11 = vpop.eup %131 }
  0x14   :  { %v57_v12 = vmul.f32 256.0, %v132_v11  ;;  %vm61_vm0 = vweird.f32 %v132_v11 }
  0x16   :  { %v58_v13 = vsub.f32 1.0, %v57_v12 }
  0x18   :  { %v59_v14 = vmul.f32 %v132_v11, %v58_v13 }
  0x19   :  { %54 = vadd.xlane.f32.xlu0 %v53_v9 }
  0x1a   :  { %v60_v15 = vadd.f32 %v132_v11, %v59_v14 }
  0x1c   :  { %v62_v16 = vsel %vm61_vm0, %v132_v11, %v60_v15 }
  0x84   :  { %v52_v17 = vpop.xlane.xlu0 %51 }
  0x85   :  { %v63_v18 = vmul.f32 %v62_v16, %v52_v17 }
  0x87   :  { %v65_v19 = vadd.f32 1e-06, %v63_v18 }
  0x89   :  { %133 = vrsqrt.f32 %v65_v19  ;;  %vm73_vm2 = vweird.f32 %v65_v19 }
  0x8c   :  { %v55_v20 = vpop.xlane.xlu0 %54 }
  0x8d   :  { %v64_v21 = vmul.f32 %v62_v16, %v55_v20 }
  0x8f   :  { %v134_v22 = vpop.eup %133  ;;  %v66_v23 = vadd.f32 1e-06, %v64_v21 }
  0x90   :  { %v68_v24 = vmul.f32 %v134_v22, %v65_v19  ;;  %vm74_vm1 = vweird.f32 %v134_v22 }
  0x91   :  { %135 = vrsqrt.f32 %v66_v23  ;;  %vm75_vm3 = vmor %vm73_vm2, %vm74_vm1  ;;  %vm83_vm5 = vweird.f32 %v66_v23 }
  0x92   :  { %v69_v25 = vmul.f32 %v134_v22, %v68_v24 }
  0x94   :  { %v70_v26 = vmul.f32 0.5, %v69_v25 }
  0x96   :  { %v71_v28 = vsub.f32 1.5, %v70_v26 }
  0x97   :  { %v136_v29 = vpop.eup %135 }
  0x98   :  { %v72_v30 = vmul.f32 %v134_v22, %v71_v28  ;;  %v78_v31 = vmul.f32 %v136_v29, %v66_v23  ;;  %vm84_vm4 = vweird.f32 %v136_v29 }
  0x99   :  { %vm85_vm6 = vmor %vm83_vm5, %vm84_vm4 }
  0x9a   :  { %v76_v34 = vsel %vm75_vm3, %v134_v22, %v72_v30  ;;  %v79_v35 = vmul.f32 %v136_v29, %v78_v31 }
  0x9b   :  { %v87_v36 = vmul.f32 %v76_v34, %v42_v0  ;;  %v88_v37 = vmul.f32 %v76_v34, %v43_v1 }
  0x9c   :  { %v80_v38 = vmul.f32 0.5, %v79_v35 }
  0x9d   :  { %v97_v39 = vmul.f32 %v93_v32, %v87_v36  ;;  %v98_v40 = vmul.f32 %v94_v33, %v88_v37 }
  0x9e   :  { %v81_v41 = vsub.f32 1.5, %v80_v38 }
  0x9f   :  { %101 = vst [vmem:[#allocation7] sm:$0xff] %v97_v39 }
  0xa0   :  { %102 = vst [vmem:[#allocation7 + $0x8] sm:$0xff] %v98_v40  ;;  %v82_v42 = vmul.f32 %v136_v29, %v81_v41 }
  0xa2   :  { %v86_v43 = vsel %vm85_vm6, %v136_v29, %v82_v42 }
  0xa3   :  { %v89_v44 = vmul.f32 %v86_v43, %v44_v4  ;;  %v90_v45 = vmul.f32 %v86_v43, %v45_v5 }
  0xa5   :  { %v99_v46 = vmul.f32 %v93_v32, %v89_v44  ;;  %v100_v47 = vmul.f32 %v94_v33, %v90_v45 }
  0xa7   :  { %103 = vst [vmem:[#allocation7 + $0x10] sm:$0xff] %v99_v46 }
  0xa8   :  { %104 = vst [vmem:[#allocation7 + $0x18] sm:$0xff] %v100_v47 }
  0xa9   :  { %117 = dma.vmem_to_hbm [thread:$0]  %s110_s1, 512, %s112_s23, [#allocation4], %s216_s17, %s216_s17, %s217_s18  }
  0xaa   :  { %213 = dma.done.wait [#allocation4], 512  }
  0xab   :  { %214 = vsyncadd [#allocation4], 4294966784 }
  0xac   :  { %122 = vsyncpa [#allocation3], 1 }
  0xad   :  { %123 = vsyncpa [#allocation6], 1 }
  0xae   :  { %124 = vsyncpa [#allocation4], 1 }

</bundles_post_ra>
